<compile_context>
chip_gen: v7x
topology: tpu7x:2x2x1
jax: 0.10.0
libtpu: 0.0.40
codegen_flags: <defaults>
</compile_context>

<pallas_src>
import math

import jax
import jax.numpy as jnp
from jax import lax
from jax.experimental import pallas as pl
from jax.experimental.pallas import tpu as pltpu


def _make_kernel(nk):
    """Build the kernel body; nk = number of K-stream steps (trace-time const)."""

    def kernel(x_ref, w1_ref, b1_ref, gamma_ref, beta_ref, w2_ref, b2_ref,
               emb_ref, h_acc):
        k = pl.program_id(0)

        # ---- mlm_linear_1: h += x_k @ w1_k, streamed over the K axis ----
        x_blk = x_ref[k]                                     # (Bp, tk), VMEM-resident
        partial = jnp.dot(x_blk, w1_ref[...],
                          preferred_element_type=jnp.float32)
        if nk == 1:
            h_acc[...] = partial
        else:
            @pl.when(k == 0)
            def _init():
                h_acc[...] = jnp.zeros_like(h_acc)

            h_acc[...] += partial

        @pl.when(k == nk - 1)
        def _finalize():
            h = h_acc[...] + b1_ref[...]                     # (Bp, H) f32

            # gelu (exact erf form, as in UER)
            h = 0.5 * h * (1.0 + lax.erf(h * (1.0 / math.sqrt(2.0))))

            # UER LayerNorm: gamma * (x - mean) / (std + eps) + beta,
            # std is unbiased (ddof=1) and eps is added to std (not variance).
            Hdim = h.shape[-1]
            mean = jnp.mean(h, axis=-1, keepdims=True)
            centered = h - mean
            var_unb = jnp.sum(centered * centered, axis=-1,
                              keepdims=True) / (Hdim - 1)
            inv = pl.reciprocal(jnp.sqrt(var_unb) + 1e-6, approx=False)  # (Bp,1)
            hn = gamma_ref[...] * (centered * inv) + beta_ref[...]

            # ---- mlm_linear_2 ----
            emb = jnp.dot(hn.astype(w2_ref.dtype), w2_ref[...],
                          preferred_element_type=jnp.float32) + b2_ref[...]
            emb_ref[...] = emb.astype(emb_ref.dtype)

    return kernel


def _pick_k_tile(H, itemsize):
    """K tile for streaming w1.

    Do not tile at all unless the compute-dtype w1 is larger than ~8 MiB;
    when tiling, prefer big tiles (each (tk, H) tile >= ~1-2 MiB) so the
    per-grid-step overhead stays well below the tile DMA time.
    """
    if H % 128 != 0 or H * H * itemsize <= 8 * 2 ** 20:
        return H
    for tk in (1024, 512, 256):
        if H % tk == 0:
            return tk
    return H


def _vmem_resident():
    """Whole-array operand living in VMEM (single copy, not pipelined)."""
    return pl.BlockSpec(memory_space=pltpu.MemorySpace.VMEM)


def multimodal_target(memory_bank, tgt, params, *, compute_dtype=jnp.bfloat16,
                      k_tile=None):
    """memory_bank: [B, S, H]; tgt: [B, P] or None. Returns (loss, emb) / emb."""
    w1, b1, gamma, beta, w2, b2 = (params[k] for k in
                                   ("w1", "b1", "gamma", "beta", "w2", "b2"))
    B, _, H = memory_bank.shape
    P = w2.shape[1]

    itemsize = jnp.dtype(compute_dtype).itemsize
    sub = 16 if itemsize == 2 else 8          # sublanes per (packed) vreg row
    Bp = max(sub, -(-B // sub) * sub)         # pad batch to full sublane group
    Pp = max(128, -(-P // 128) * 128)         # lane-dense output columns

    # Glue: CLS-token slice, pads, bf16 cast of the matmul operands.
    x0 = memory_bank[:, 0, :]
    if Bp != B:
        x0 = jnp.pad(x0, ((0, Bp - B), (0, 0)))
    x0 = x0.astype(compute_dtype)
    w1c = w1.astype(compute_dtype)
    w2c = w2.astype(compute_dtype)
    b2f = b2.astype(jnp.float32)
    if Pp != P:
        w2c = jnp.pad(w2c, ((0, 0), (0, Pp - P)))
        b2f = jnp.pad(b2f, ((0, Pp - P),))

    tk = k_tile if k_tile is not None else _pick_k_tile(H, itemsize)
    assert H % tk == 0, "k_tile must divide hidden_size"
    nk = H // tk

    # x0 is tiny: keep it fully VMEM-resident as (nk, Bp, tk) and let the
    # kernel index slab k (one up-front DMA instead of nk small streamed ones).
    x0r = x0.reshape(Bp, nk, tk).transpose(1, 0, 2)

    # Small params stay f32 (bias / LayerNorm math is done in f32).
    b1_2d = b1.reshape(1, H).astype(jnp.float32)
    gamma_2d = gamma.reshape(1, H).astype(jnp.float32)
    beta_2d = beta.reshape(1, H).astype(jnp.float32)
    b2_2d = b2f.reshape(1, Pp)

    # Generation-aware VMEM cap (v5e/v6e: 128 MiB physical, v7x: 64 MiB).
    try:
        vmem_cap = int(pltpu.get_tpu_info().vmem_capacity_bytes)
    except Exception:
        vmem_cap = 64 * 2 ** 20               # conservative: assume v7x
    vmem_cap_limit = int(0.8 * vmem_cap)

    # w1 is the only pipelined operand.  Deepen its buffering only on the
    # big-VMEM chips and only when the stream is long enough to benefit.
    if nk == 1:
        w1_spec = _vmem_resident()
        w1_bufs = 1
    elif nk >= 4 and vmem_cap >= 100 * 2 ** 20:
        w1_spec = pl.BlockSpec((tk, H), lambda k: (k, 0),
                               pipeline_mode=pl.Buffered(3))
        w1_bufs = 3
    else:
        w1_spec = pl.BlockSpec((tk, H), lambda k: (k, 0))
        w1_bufs = 2

    # Tight VMEM estimate (resident operands are single-buffered now).
    est = (Bp * H * itemsize                  # x0 (resident)
           + w1_bufs * tk * H * itemsize      # w1 stream
           + H * Pp * itemsize                # w2 (resident, single copy)
           + (3 * H + Pp) * 4                 # b1 / gamma / beta / b2
           + Bp * Pp * 4                      # emb output (resident)
           + Bp * H * 4)                      # h accumulator scratch
    vmem_limit = int(min(max(int(1.4 * est), 16 * 2 ** 20), vmem_cap_limit))

    emb_p = pl.pallas_call(
        _make_kernel(nk),
        out_shape=jax.ShapeDtypeStruct((Bp, Pp), jnp.float32),
        grid_spec=pltpu.PrefetchScalarGridSpec(
            num_scalar_prefetch=0,
            grid=(nk,),
            in_specs=[
                _vmem_resident(),            # x0  (nk, Bp, tk)
                w1_spec,                     # w1  streamed over K (or resident)
                _vmem_resident(),            # b1
                _vmem_resident(),            # gamma
                _vmem_resident(),            # beta
                _vmem_resident(),            # w2
                _vmem_resident(),            # b2
            ],
            out_specs=_vmem_resident(),      # emb, lane-dense (Bp, Pp)
            scratch_shapes=[pltpu.VMEM((Bp, H), jnp.float32)],
        ),
        compiler_params=pltpu.CompilerParams(
            dimension_semantics=("arbitrary",),  # K is a reduction axis
            vmem_limit_bytes=vmem_limit,
        ),
    )(x0r, w1c, b1_2d, gamma_2d, beta_2d, w2c, b2_2d)

    emb = emb_p[:B, :P]
    if tgt is None:
        return emb

    # CosineEmbeddingLoss with target = +1, reduction='mean'; O(B*P) so it is
    # done in plain JAX (per perf review) instead of a masked (1,1) VMEM store.
    emb_f = emb.astype(jnp.float32)
    tgt_f = tgt.astype(jnp.float32)
    dot = jnp.sum(emb_f * tgt_f, axis=-1)
    nx = jnp.sqrt(jnp.sum(emb_f * emb_f, axis=-1))
    ny = jnp.sqrt(jnp.sum(tgt_f * tgt_f, axis=-1))
    cos = dot / jnp.maximum(nx * ny, 1e-8)
    loss = jnp.mean(1.0 - cos)
    return loss, emb


def _reference_forward(memory_bank, tgt, params):
    """Plain-JAX f32 reference of the PyTorch module (for a sanity check)."""
    x = memory_bank[:, 0, :].astype(jnp.float32)
    h = x @ params["w1"] + params["b1"]
    h = 0.5 * h * (1.0 + lax.erf(h / math.sqrt(2.0)))
    mean = h.mean(-1, keepdims=True)
    c = h - mean
    std = jnp.sqrt((c * c).sum(-1, keepdims=True) / (h.shape[-1] - 1))
    h = params["gamma"] * c / (std + 1e-6) + params["beta"]
    emb = h @ params["w2"] + params["b2"]
    dot = jnp.sum(emb * tgt, axis=-1)
    cos = dot / jnp.maximum(jnp.linalg.norm(emb, axis=-1)
                            * jnp.linalg.norm(tgt, axis=-1), 1e-8)
    return jnp.mean(1.0 - cos), emb


def init_params(key, hidden_size, photo_emb_size):
    k1, k2, k3, k4 = jax.random.split(key, 4)
    bound1 = 1.0 / math.sqrt(hidden_size)
    return {
        # nn.Linear stores weight as [out, in]; we keep [in, out] for x @ W.
        "w1": jax.random.uniform(k1, (hidden_size, hidden_size),
                                 jnp.float32, -bound1, bound1),
        "b1": jax.random.uniform(k2, (hidden_size,), jnp.float32, -bound1, bound1),
        "gamma": jnp.ones((hidden_size,), jnp.float32),
        "beta": jnp.zeros((hidden_size,), jnp.float32),
        "w2": jax.random.uniform(k3, (hidden_size, photo_emb_size),
                                 jnp.float32, -bound1, bound1),
        "b2": jax.random.uniform(k4, (photo_emb_size,), jnp.float32,
                                 -bound1, bound1),
    }


if __name__ == "__main__":
    # Small TPU-friendly shapes: B multiple of 8, H & P multiples of 128.
    B, S, H, P = 8, 8, 256, 256     # batch, seq, hidden_size, photo_emb_size
    key = jax.random.PRNGKey(0)
    k_mb, k_tgt, k_par = jax.random.split(key, 3)

    memory_bank = jax.random.normal(k_mb, (B, S, H), jnp.float32)
    tgt = jax.random.normal(k_tgt, (B, P), jnp.float32)
    params = init_params(k_par, H, P)

    # Default path: w1 small enough to stay VMEM-resident (nk == 1).
    loss, emb = multimodal_target(memory_bank, tgt, params)
    jax.block_until_ready((loss, emb))

    # Forced K-streaming path (nk == 2) to also exercise the accumulator grid.
    loss2, emb2 = multimodal_target(memory_bank, tgt, params, k_tile=128)
    jax.block_until_ready((loss2, emb2))

    assert emb.shape == (B, P) and loss.shape == ()
    assert emb2.shape == (B, P) and loss2.shape == ()

    # Sanity check vs. plain-JAX f32 reference (loose tolerance: bf16 weights).
    ref_loss, ref_emb = _reference_forward(memory_bank, tgt, params)
    assert bool(jnp.allclose(emb, ref_emb, rtol=8e-2, atol=8e-2))
    assert bool(jnp.allclose(emb2, ref_emb, rtol=8e-2, atol=8e-2))
    assert abs(float(loss) - float(ref_loss)) < 3e-2
    assert abs(float(loss2) - float(ref_loss)) < 3e-2

    print("KERNEL_OK")
</pallas_src>

<mosaic_0001>
module attributes {stable_mosaic.version = 11 : i64} {
  func.func @kernel(%arg0: i32, %arg1: memref<1x16x256xbf16, #tpu.memory_space<vmem>>, %arg2: memref<256x256xbf16, #tpu.memory_space<vmem>>, %arg3: memref<1x256xf32, #tpu.memory_space<vmem>>, %arg4: memref<1x256xf32, #tpu.memory_space<vmem>>, %arg5: memref<1x256xf32, #tpu.memory_space<vmem>>, %arg6: memref<256x256xbf16, #tpu.memory_space<vmem>>, %arg7: memref<1x256xf32, #tpu.memory_space<vmem>>, %arg8: memref<16x256xf32, #tpu.memory_space<vmem>>, %arg9: memref<16x256xf32, #tpu.memory_space<vmem>>) attributes {dimension_semantics = [#tpu.dimension_semantics<arbitrary>], iteration_bounds = array<i64: 1>, scalar_prefetch = 0 : i64, scratch_operands = 1 : i64, tpu.core_type = #tpu.core_type<tc>, window_params = [{pipeline_mode = #tpu.pipeline_mode<synchronous>, transform_indices = @transform_0, window_bounds = array<i64: 1, 16, 256>}, {pipeline_mode = #tpu.pipeline_mode<synchronous>, transform_indices = @transform_1, window_bounds = array<i64: 256, 256>}, {pipeline_mode = #tpu.pipeline_mode<synchronous>, transform_indices = @transform_2, window_bounds = array<i64: 1, 256>}, {pipeline_mode = #tpu.pipeline_mode<synchronous>, transform_indices = @transform_3, window_bounds = array<i64: 1, 256>}, {pipeline_mode = #tpu.pipeline_mode<synchronous>, transform_indices = @transform_4, window_bounds = array<i64: 1, 256>}, {pipeline_mode = #tpu.pipeline_mode<synchronous>, transform_indices = @transform_5, window_bounds = array<i64: 256, 256>}, {pipeline_mode = #tpu.pipeline_mode<synchronous>, transform_indices = @transform_6, window_bounds = array<i64: 1, 256>}, {pipeline_mode = #tpu.pipeline_mode<synchronous>, transform_indices = @transform_7, window_bounds = array<i64: 16, 256>}]} {
    %0 = arith.index_cast %arg0 : i32 to index
    %c0 = arith.constant 0 : index
    %c0_0 = arith.constant 0 : index
    %1 = vector.load %arg1[%0, %c0, %c0_0] : memref<1x16x256xbf16, #tpu.memory_space<vmem>>, vector<1x16x256xbf16>
    %2 = vector.shape_cast %1 : vector<1x16x256xbf16> to vector<16x256xbf16>
    %c0_1 = arith.constant 0 : index
    %c0_2 = arith.constant 0 : index
    %3 = vector.load %arg2[%c0_1, %c0_2] : memref<256x256xbf16, #tpu.memory_space<vmem>>, vector<256x256xbf16>
    %cst = arith.constant dense<0.000000e+00> : vector<16x256xf32>
    %4 = tpu.matmul %2, %3, %cst {dimension_numbers = #tpu.dot_dimension_numbers<[1], [0], [0], [1], [0, 0, 1, 1], [], []>} : vector<16x256xbf16>, vector<256x256xbf16>, vector<16x256xf32> -> vector<16x256xf32>
    %c0_3 = arith.constant 0 : index
    %c0_4 = arith.constant 0 : index
    %5 = vector.load %arg9[%c0_3, %c0_4] : memref<16x256xf32, #tpu.memory_space<vmem>>, vector<16x256xf32>
    tpu.vector_store %arg9[%c0_3, %c0_4], %4 {strides = array<i32>} : memref<16x256xf32, #tpu.memory_space<vmem>>, vector<16x256xf32>,
    %c0_i32 = arith.constant 0 : i32
    %6 = arith.cmpi eq, %arg0, %c0_i32 : i32
    %7 = arith.extui %6 : i1 to i32
    %c0_i32_5 = arith.constant 0 : i32
    %8 = arith.cmpi ne, %7, %c0_i32_5 : i32
    scf.if %8 {
      %c0_6 = arith.constant 0 : index
      %c0_7 = arith.constant 0 : index
      %9 = vector.load %arg9[%c0_6, %c0_7] : memref<16x256xf32, #tpu.memory_space<vmem>>, vector<16x256xf32>
      %c0_8 = arith.constant 0 : index
      %c0_9 = arith.constant 0 : index
      %10 = vector.load %arg3[%c0_8, %c0_9] : memref<1x256xf32, #tpu.memory_space<vmem>>, vector<1x256xf32>
      %11 = vector.broadcast %10 : vector<1x256xf32> to vector<16x256xf32>
      %12 = arith.addf %9, %11 : vector<16x256xf32>
      %cst_10 = arith.constant 5.000000e-01 : f32
      %13 = vector.broadcast %cst_10 : f32 to vector<16x256xf32>
      %14 = arith.mulf %13, %12 : vector<16x256xf32>
      %cst_11 = arith.constant 0.707106769 : f32
      %15 = vector.broadcast %cst_11 : f32 to vector<16x256xf32>
      %16 = arith.mulf %12, %15 : vector<16x256xf32>
      %17 = math.erf %16 : vector<16x256xf32>
      %cst_12 = arith.constant 1.000000e+00 : f32
      %18 = vector.broadcast %cst_12 : f32 to vector<16x256xf32>
      %19 = arith.addf %18, %17 : vector<16x256xf32>
      %20 = arith.mulf %14, %19 : vector<16x256xf32>
      %cst_13 = arith.constant dense<0.000000e+00> : vector<16xf32>
      %21 = vector.multi_reduction <add>, %20, %cst_13 [1] : vector<16x256xf32> to vector<16xf32>
      %22 = vector.shape_cast %21 : vector<16xf32> to vector<16x1xf32>
      %cst_14 = arith.constant 2.560000e+02 : f32
      %23 = vector.broadcast %cst_14 : f32 to vector<16x1xf32>
      %24 = arith.divf %22, %23 : vector<16x1xf32>
      %25 = vector.broadcast %24 : vector<16x1xf32> to vector<16x256xf32>
      %26 = arith.subf %20, %25 : vector<16x256xf32>
      %27 = arith.mulf %26, %26 : vector<16x256xf32>
      %cst_15 = arith.constant dense<0.000000e+00> : vector<16xf32>
      %28 = vector.multi_reduction <add>, %27, %cst_15 [1] : vector<16x256xf32> to vector<16xf32>
      %29 = vector.shape_cast %28 : vector<16xf32> to vector<16x1xf32>
      %cst_16 = arith.constant 2.550000e+02 : f32
      %30 = vector.broadcast %cst_16 : f32 to vector<16x1xf32>
      %31 = arith.divf %29, %30 : vector<16x1xf32>
      %32 = math.sqrt %31 : vector<16x1xf32>
      %cst_17 = arith.constant 9.99999997E-7 : f32
      %33 = vector.broadcast %cst_17 : f32 to vector<16x1xf32>
      %34 = arith.addf %32, %33 : vector<16x1xf32>
      %35 = tpu.reciprocal %34 : vector<16x1xf32> -> vector<16x1xf32>
      %c0_18 = arith.constant 0 : index
      %c0_19 = arith.constant 0 : index
      %36 = vector.load %arg4[%c0_18, %c0_19] : memref<1x256xf32, #tpu.memory_space<vmem>>, vector<1x256xf32>
      %37 = vector.broadcast %35 : vector<16x1xf32> to vector<16x256xf32>
      %38 = arith.mulf %26, %37 : vector<16x256xf32>
      %39 = vector.broadcast %36 : vector<1x256xf32> to vector<16x256xf32>
      %40 = arith.mulf %39, %38 : vector<16x256xf32>
      %c0_20 = arith.constant 0 : index
      %c0_21 = arith.constant 0 : index
      %41 = vector.load %arg5[%c0_20, %c0_21] : memref<1x256xf32, #tpu.memory_space<vmem>>, vector<1x256xf32>
      %42 = vector.broadcast %41 : vector<1x256xf32> to vector<16x256xf32>
      %43 = arith.addf %40, %42 : vector<16x256xf32>
      %44 = arith.truncf %43 : vector<16x256xf32> to vector<16x256xbf16>
      %c0_22 = arith.constant 0 : index
      %c0_23 = arith.constant 0 : index
      %45 = vector.load %arg6[%c0_22, %c0_23] : memref<256x256xbf16, #tpu.memory_space<vmem>>, vector<256x256xbf16>
      %cst_24 = arith.constant dense<0.000000e+00> : vector<16x256xf32>
      %46 = tpu.matmul %44, %45, %cst_24 {dimension_numbers = #tpu.dot_dimension_numbers<[1], [0], [0], [1], [0, 0, 1, 1], [], []>} : vector<16x256xbf16>, vector<256x256xbf16>, vector<16x256xf32> -> vector<16x256xf32>
      %c0_25 = arith.constant 0 : index
      %c0_26 = arith.constant 0 : index
      %47 = vector.load %arg7[%c0_25, %c0_26] : memref<1x256xf32, #tpu.memory_space<vmem>>, vector<1x256xf32>
      %48 = vector.broadcast %47 : vector<1x256xf32> to vector<16x256xf32>
      %49 = arith.addf %46, %48 : vector<16x256xf32>
      %c0_27 = arith.constant 0 : index
      %c0_28 = arith.constant 0 : index
      %50 = vector.load %arg8[%c0_27, %c0_28] : memref<16x256xf32, #tpu.memory_space<vmem>>, vector<16x256xf32>
      tpu.vector_store %arg8[%c0_27, %c0_28], %49 {strides = array<i32>} : memref<16x256xf32, #tpu.memory_space<vmem>>, vector<16x256xf32>,
    } else {
    }
    return
  }
  func.func @transform_0(%arg0: i32) -> (i32, i32, i32) {
    %c0_i32 = arith.constant 0 : i32
    %c0_i32_0 = arith.constant 0 : i32
    %c0_i32_1 = arith.constant 0 : i32
    %c0_i32_2 = arith.constant 0 : i32
    return %c0_i32, %c0_i32_0, %c0_i32_1 : i32, i32, i32
  }
  func.func @transform_1(%arg0: i32) -> (i32, i32) {
    %c0_i32 = arith.constant 0 : i32
    %c0_i32_0 = arith.constant 0 : i32
    %c0_i32_1 = arith.constant 0 : i32
    return %c0_i32, %c0_i32_0 : i32, i32
  }
  func.func @transform_2(%arg0: i32) -> (i32, i32) {
    %c0_i32 = arith.constant 0 : i32
    %c0_i32_0 = arith.constant 0 : i32
    %c0_i32_1 = arith.constant 0 : i32
    return %c0_i32, %c0_i32_0 : i32, i32
  }
  func.func @transform_3(%arg0: i32) -> (i32, i32) {
    %c0_i32 = arith.constant 0 : i32
    %c0_i32_0 = arith.constant 0 : i32
    %c0_i32_1 = arith.constant 0 : i32
    return %c0_i32, %c0_i32_0 : i32, i32
  }
  func.func @transform_4(%arg0: i32) -> (i32, i32) {
    %c0_i32 = arith.constant 0 : i32
    %c0_i32_0 = arith.constant 0 : i32
    %c0_i32_1 = arith.constant 0 : i32
    return %c0_i32, %c0_i32_0 : i32, i32
  }
  func.func @transform_5(%arg0: i32) -> (i32, i32) {
    %c0_i32 = arith.constant 0 : i32
    %c0_i32_0 = arith.constant 0 : i32
    %c0_i32_1 = arith.constant 0 : i32
    return %c0_i32, %c0_i32_0 : i32, i32
  }
  func.func @transform_6(%arg0: i32) -> (i32, i32) {
    %c0_i32 = arith.constant 0 : i32
    %c0_i32_0 = arith.constant 0 : i32
    %c0_i32_1 = arith.constant 0 : i32
    return %c0_i32, %c0_i32_0 : i32, i32
  }
  func.func @transform_7(%arg0: i32) -> (i32, i32) {
    %c0_i32 = arith.constant 0 : i32
    %c0_i32_0 = arith.constant 0 : i32
    %c0_i32_1 = arith.constant 0 : i32
    return %c0_i32, %c0_i32_0 : i32, i32
  }
}

</mosaic_0001>

<bundles_post_ra>
// kernel: tpu_custom_call.1
= control target key start
LH: loop header
LB: loop body
LE: loop exit
PB: predicated region body
PF: predicated region fallthrough
CT: control target
= control target key end

     0   :  { %12 = vsyncpa [#allocation4], 0  ;;  %s1156_s0 = inlined_call_operand.hbm [shape: bf16[1,16,256], index: 0, kind: input, shape index: {}]   ;;  %s1157_s1 = inlined_call_operand.hbm [shape: bf16[256,256], index: 1, kind: input, shape index: {}]   ;;  %s1158_s2 = inlined_call_operand.vmem [shape: f32[1,256], index: 2, kind: input, shape index: {}]   ;;  %s1159_s3 = inlined_call_operand.vmem [shape: f32[1,256], index: 3, kind: input, shape index: {}]   ;;  %s1160_s4 = inlined_call_operand.vmem [shape: f32[1,256], index: 4, kind: input, shape index: {}]   ;;  %s1161_s5 = inlined_call_operand.hbm [shape: bf16[256,256], index: 5, kind: input, shape index: {}]   ;;  %s1162_s6 = inlined_call_operand.vmem [shape: f32[1,256], index: 6, kind: input, shape index: {}]   ;;  %s1163_s7 = inlined_call_operand.hbm [shape: f32[16,256], index: 7, kind: output, shape index: {}]  }
   0x1   :  { %13 = vsyncpa [#allocation7], 0 }
   0x2   :  { %14 = vsyncpa [#allocation5], 0  ;;  %s1000_s24 = smov [#allocation6]   ;;  %s1001_s26 = smov [#allocation3]  }
   0x3   :  { %s32_s25 = sshll.u32 %s1000_s24, 4  ;;  %s20_s27 = sshll.u32 %s1001_s26, 4  ;;  %s33_s25 = int_to_ptr.vmem [resolvable:$true] %s32_s25  ;;  %s1048_s27 = int_to_ptr.vmem [resolvable:$true] %s20_s27 }
   0x4   :  { %s906_s30 = scalar_lea.hbm %s1157_s1, 4096 }
   0x5   :  { %p907_p0 = scmp.ne.s32.totalorder %s1157_s1, %s906_s30  ;;  %p910_p1 = scmp.lt.u32.totalorder %s906_s30, %s1157_s1 }
   0x7   :  { %p912_p2 = pnand %p910_p1, %p907_p0 }
   0x9   :  { %915 = shalt.err (!%p912_p2)
}
   0xa   :  { %s916_s12 = scalar_lea.vmem %s33_s25, 4096  ;;  %p921_p4 = scmp.lt.s32.totalorder %s33_s25, %s33_s25 }
   0xb   :  { %p917_p3 = scmp.ne.s32.totalorder %s33_s25, %s916_s12  ;;  %p922_p5 = scmp.lt.s32.totalorder %s916_s12, %s916_s12 }
   0xd   :  { %p923_p6 = por %p922_p5, %p921_p4 }
   0xf   :  { %p924_p7 = pnand %p923_p6, %p917_p3 }
  0x11   :  { %927 = shalt.err (!%p924_p7)
}
  0x12   :  { %s1002_s13 = smov 128   ;;  %s1003_s14 = smov 8  }
  0x13   :  { %38 = dma.hbm_to_vmem [thread:$0]  %s1157_s1, 4096, %s33_s25, [#allocation7], %s1002_s13, %s1002_s13, %s1003_s14  }
  0x14   :  { %s928_s19 = scalar_lea.hbm %s1156_s0, 256 }
  0x15   :  { %p929_p8 = scmp.ne.s32.totalorder %s1156_s0, %s928_s19  ;;  %p932_p9 = scmp.lt.u32.totalorder %s928_s19, %s1156_s0 }
  0x17   :  { %p934_p10 = pnand %p932_p9, %p929_p8 }
  0x19   :  { %937 = shalt.err (!%p934_p10)
}
  0x1a   :  { %s938_s24 = scalar_lea.vmem %s1048_s27, 256  ;;  %p943_p12 = scmp.lt.s32.totalorder %s1048_s27, %s1048_s27 }
  0x1b   :  { %p939_p11 = scmp.ne.s32.totalorder %s1048_s27, %s938_s24  ;;  %p944_p13 = scmp.lt.s32.totalorder %s938_s24, %s938_s24 }
  0x1d   :  { %p945_p0 = por %p944_p13, %p943_p12 }
  0x1f   :  { %p946_p1 = pnand %p945_p0, %p939_p11 }
  0x21   :  { %949 = shalt.err (!%p946_p1)
}
  0x22   :  { %26 = dma.hbm_to_vmem [thread:$0]  %s1156_s0, 256, %s1048_s27, [#allocation4], %s1002_s13, %s1002_s13, %s1003_s14  }
  0x23   :  { %s1004_s26 = smov [#allocation8]   ;;  %s950_s8 = scalar_lea.hbm %s1161_s5, 4096 }
  0x24   :  { %s50_s28 = sshll.u32 %s1004_s26, 4  ;;  %p951_p2 = scmp.ne.s32.totalorder %s1161_s5, %s950_s8  ;;  %s51_s28 = int_to_ptr.vmem [resolvable:$true] %s50_s28 }
  0x25   :  { %p954_p3 = scmp.lt.u32.totalorder %s950_s8, %s1161_s5 }
  0x27   :  { %p956_p4 = pnand %p954_p3, %p951_p2 }
  0x29   :  { %959 = shalt.err (!%p956_p4)
}
  0x2a   :  { %s960_s15 = scalar_lea.vmem %s51_s28, 4096  ;;  %p965_p6 = scmp.lt.s32.totalorder %s51_s28, %s51_s28 }
  0x2b   :  { %p961_p5 = scmp.ne.s32.totalorder %s51_s28, %s960_s15  ;;  %p966_p7 = scmp.lt.s32.totalorder %s960_s15, %s960_s15 }
  0x2d   :  { %p967_p8 = por %p966_p7, %p965_p6 }
  0x2f   :  { %p968_p9 = pnand %p967_p8, %p961_p5 }
  0x31   :  { %971 = shalt.err (!%p968_p9)
}
  0x32   :  { %56 = dma.hbm_to_vmem [thread:$0]  %s1161_s5, 4096, %s51_s28, [#allocation7], %s1002_s13, %s1002_s13, %s1003_s14  }
  0x33   :  { %994 = dma.done.wait [#allocation4], 256  }
  0x34   :  { %995 = vsyncadd [#allocation4], 4294967040 }
  0x35   :  { %996 = dma.done.wait [#allocation7], 8192  }
  0x36   :  { %997 = vsyncadd [#allocation7], 4294959104  ;;  %v791_v0 = vld [vmem:[#allocation6 + $0x4] ss:$8 sps:$4 sm:$0xff]   ;;  %v793_v1 = vld [vmem:[#allocation6] ss:$8 sps:$4 sm:$0xff]   ;;  %v332_v34 = vlaneseq }
  0x37   :  { %275 = vmatprep.subr.bf16.mxu0 %v791_v0  ;;  %v794_v2 = vld [vmem:[#allocation6 + $0x14] ss:$8 sps:$4 sm:$0xff]   ;;  %v796_v3 = vld [vmem:[#allocation6 + $0x10] ss:$8 sps:$4 sm:$0xff]   ;;  %v797_v4 = vld [vmem:[#allocation6 + $0x24] ss:$8 sps:$4 sm:$0xff]  }
  0x38   :  { %276 = vmatpush1.bf16.msra.mxu0 %v793_v1  ;;  %v799_v5 = vld [vmem:[#allocation6 + $0x20] ss:$8 sps:$4 sm:$0xff]   ;;  %v800_v6 = vld [vmem:[#allocation6 + $0x34] ss:$8 sps:$4 sm:$0xff]   ;;  %v802_v7 = vld [vmem:[#allocation6 + $0x30] ss:$8 sps:$4 sm:$0xff]  }
  0x39   :  { %277 = vmatprep.subr.bf16.mxu0 %v794_v2  ;;  %v803_v8 = vld [vmem:[#allocation6 + $0x44] ss:$8 sps:$4 sm:$0xff]   ;;  %v805_v9 = vld [vmem:[#allocation6 + $0x40] ss:$8 sps:$4 sm:$0xff]   ;;  %v806_v10 = vld [vmem:[#allocation6 + $0x54] ss:$8 sps:$4 sm:$0xff]  }
  0x3a   :  { %v808_v11 = vld [vmem:[#allocation6 + $0x50] ss:$8 sps:$4 sm:$0xff]   ;;  %v809_v12 = vld [vmem:[#allocation6 + $0x64] ss:$8 sps:$4 sm:$0xff]   ;;  %v811_v13 = vld [vmem:[#allocation6 + $0x60] ss:$8 sps:$4 sm:$0xff]  }
  0x3b   :  { %v812_v14 = vld [vmem:[#allocation6 + $0x74] ss:$8 sps:$4 sm:$0xff]   ;;  %v814_v16 = vld [vmem:[#allocation6 + $0x70] ss:$8 sps:$4 sm:$0xff]   ;;  %v815_v17 = vld [vmem:[#allocation6 + $0x84] ss:$8 sps:$4 sm:$0xff]  }
  0x3c   :  { %278 = vmatpush1.bf16.msra.mxu0 %v796_v3  ;;  %v841_v15 = vld [vmem:[#allocation3 + $0x4] ss:$8 sps:$4 sm:$0xff]   ;;  %v817_v18 = vld [vmem:[#allocation6 + $0x80] ss:$8 sps:$4 sm:$0xff]   ;;  %v820_v20 = vld [vmem:[#allocation6 + $0x90] ss:$8 sps:$4 sm:$0xff]  }
  0x3d   :  { %279 = vmatprep.subr.bf16.mxu0 %v797_v4  ;;  %307 = vmatprep.mubr.bf16.mxu0 %v841_v15  ;;  %v818_v19 = vld [vmem:[#allocation6 + $0x94] ss:$8 sps:$4 sm:$0xff]   ;;  %v821_v21 = vld [vmem:[#allocation6 + $0xa4] ss:$8 sps:$4 sm:$0xff]   ;;  %v823_v22 = vld [vmem:[#allocation6 + $0xa0] ss:$8 sps:$4 sm:$0xff]  }
  0x3e   :  { %v824_v23 = vld [vmem:[#allocation6 + $0xb4] ss:$8 sps:$4 sm:$0xff]   ;;  %v826_v24 = vld [vmem:[#allocation6 + $0xb0] ss:$8 sps:$4 sm:$0xff]   ;;  %v827_v25 = vld [vmem:[#allocation6 + $0xc4] ss:$8 sps:$4 sm:$0xff]  }
  0x3f   :  { %v829_v26 = vld [vmem:[#allocation6 + $0xc0] ss:$8 sps:$4 sm:$0xff]   ;;  %v830_v27 = vld [vmem:[#allocation6 + $0xd4] ss:$8 sps:$4 sm:$0xff]   ;;  %v832_v28 = vld [vmem:[#allocation6 + $0xd0] ss:$8 sps:$4 sm:$0xff]  }
  0x40   :  { %280 = vmatpush1.bf16.msra.mxu0 %v799_v5  ;;  %v833_v29 = vld [vmem:[#allocation6 + $0xe4] ss:$8 sps:$4 sm:$0xff]   ;;  %v835_v30 = vld [vmem:[#allocation6 + $0xe0] ss:$8 sps:$4 sm:$0xff]   ;;  %v836_v31 = vld [vmem:[#allocation6 + $0xf4] ss:$8 sps:$4 sm:$0xff]  }
  0x41   :  { %281 = vmatprep.subr.bf16.mxu0 %v800_v6  ;;  %v838_v32 = vld [vmem:[#allocation6 + $0xf0] ss:$8 sps:$4 sm:$0xff]   ;;  %v333_v35 = vshrl.u32 %v332_v34, 7  ;;  %v854_v15 = vld [vmem:[#allocation8 + $0x44] ss:$8 sps:$4 sm:$0xff]   ;;  %s1005_s18 = smov [#allocation9]  }
  0x42   :  { %v839_v33 = vld [vmem:[#allocation3] ss:$8 sps:$4 sm:$0xff]   ;;  %v862_v34 = vld [vmem:[#allocation8 + $0x60] ss:$8 sps:$4 sm:$0xff]   ;;  %s704_s19 = sshll.u32 %s1005_s18, 4  ;;  %s705_s19 = int_to_ptr.vmem [resolvable:$true] %s704_s19 }
  0x43   :  { %v1100_v36 = vsub.s32 0, %v333_v35  ;;  %v330_v37 = vld [vmem:[%s1158_s2] sm:$0x3]  ;;  %v1105_v38 = vsub.s32 1, %v333_v35  ;;  %v863_v35 = vld [vmem:[#allocation8 + $0x74] ss:$8 sps:$4 sm:$0xff]   ;;  %p977_p11 = scmp.lt.s32.totalorder %s705_s19, %s705_s19 }
  0x44   :  { %282 = vmatpush1.bf16.msra.mxu0 %v802_v7  ;;  %v842_v7 = vld [vmem:[#allocation8 + $0x4] ss:$8 sps:$4 sm:$0xff]  }
  0x45   :  { %283 = vmatprep.subr.bf16.mxu0 %v803_v8  ;;  %v335_v39 = vrot.slane %v330_v37, %v1100_v36  ;;  %v339_v40 = vrot.slane %v330_v37, %v1105_v38  ;;  %v844_v8 = vld [vmem:[#allocation8] ss:$8 sps:$4 sm:$0xff]   ;;  %652 = vmatprep.subr.bf16.mxu1 %v842_v7  ;;  %v865_v37 = vld [vmem:[#allocation8 + $0x70] ss:$8 sps:$4 sm:$0xff]  }
  0x46   :  { %653 = vmatpush1.bf16.msra.mxu1 %v844_v8  ;;  %v410_v7 = vld [vmem:[%s1159_s3] sm:$0x3] }
  0x48   :  { %284 = vmatpush1.bf16.msra.mxu0 %v805_v9  ;;  %v845_v9 = vld [vmem:[#allocation8 + $0x14] ss:$8 sps:$4 sm:$0xff]  }
  0x49   :  { %285 = vmatprep.subr.bf16.mxu0 %v806_v10  ;;  %v847_v10 = vld [vmem:[#allocation8 + $0x10] ss:$8 sps:$4 sm:$0xff]   ;;  %654 = vmatprep.subr.bf16.mxu1 %v845_v9 }
  0x4a   :  { %655 = vmatpush1.bf16.msra.mxu1 %v847_v10  ;;  %v419_v10 = vrot.slane %v410_v7, %v1100_v36 }
  0x4c   :  { %286 = vmatpush1.bf16.msra.mxu0 %v808_v11  ;;  %v848_v11 = vld [vmem:[#allocation8 + $0x24] ss:$8 sps:$4 sm:$0xff]  }
  0x4d   :  { %287 = vmatprep.subr.bf16.mxu0 %v809_v12  ;;  %v850_v12 = vld [vmem:[#allocation8 + $0x20] ss:$8 sps:$4 sm:$0xff]   ;;  %656 = vmatprep.subr.bf16.mxu1 %v848_v11  ;;  %v423_v11 = vrot.slane %v410_v7, %v1105_v38 }
  0x4e   :  { %657 = vmatpush1.bf16.msra.mxu1 %v850_v12  ;;  %v430_v12 = vld [vmem:[%s1160_s4] sm:$0x3] }
  0x50   :  { %288 = vmatpush1.bf16.msra.mxu0 %v811_v13  ;;  %v851_v13 = vld [vmem:[#allocation8 + $0x34] ss:$8 sps:$4 sm:$0xff]  }
  0x51   :  { %289 = vmatprep.subr.bf16.mxu0 %v812_v14  ;;  %v853_v14 = vld [vmem:[#allocation8 + $0x30] ss:$8 sps:$4 sm:$0xff]   ;;  %658 = vmatprep.subr.bf16.mxu1 %v851_v13 }
  0x52   :  { %659 = vmatpush1.bf16.msra.mxu1 %v853_v14 }
  0x53   :  { %660 = vmatprep.subr.bf16.mxu1 %v854_v15  ;;  %v435_v15 = vrot.slane %v430_v12, %v1100_v36 }
  0x54   :  { %290 = vmatpush1.bf16.msra.mxu0 %v814_v16  ;;  %v856_v16 = vld [vmem:[#allocation8 + $0x40] ss:$8 sps:$4 sm:$0xff]  }
  0x55   :  { %291 = vmatprep.subr.bf16.mxu0 %v815_v17  ;;  %v857_v17 = vld [vmem:[#allocation8 + $0x54] ss:$8 sps:$4 sm:$0xff]  }
  0x56   :  { %661 = vmatpush1.bf16.msra.mxu1 %v856_v16  ;;  %v439_v16 = vrot.slane %v430_v12, %v1105_v38 }
  0x57   :  { %662 = vmatprep.subr.bf16.mxu1 %v857_v17 }
  0x58   :  { %292 = vmatpush1.bf16.msra.mxu0 %v817_v18 }
  0x59   :  { %293 = vmatprep.subr.bf16.mxu0 %v818_v19 }
  0x5c   :  { %294 = vmatpush1.bf16.msra.mxu0 %v820_v20 }
  0x5d   :  { %295 = vmatprep.subr.bf16.mxu0 %v821_v21 }
  0x60   :  { %296 = vmatpush1.bf16.msra.mxu0 %v823_v22 }
  0x61   :  { %297 = vmatprep.subr.bf16.mxu0 %v824_v23 }
  0x64   :  { %298 = vmatpush1.bf16.msra.mxu0 %v826_v24 }
  0x65   :  { %299 = vmatprep.subr.bf16.mxu0 %v827_v25 }
  0x68   :  { %300 = vmatpush1.bf16.msra.mxu0 %v829_v26 }
  0x69   :  { %301 = vmatprep.subr.bf16.mxu0 %v830_v27 }
  0x6c   :  { %302 = vmatpush1.bf16.msra.mxu0 %v832_v28 }
  0x6d   :  { %303 = vmatprep.subr.bf16.mxu0 %v833_v29 }
  0x70   :  { %304 = vmatpush1.bf16.msra.mxu0 %v835_v30 }
  0x71   :  { %305 = vmatprep.subr.bf16.mxu0 %v836_v31 }
  0x74   :  { %306 = vmatpush1.bf16.msra.mxu0 %v838_v32  ;;  %v859_v32 = vld [vmem:[#allocation8 + $0x50] ss:$8 sps:$4 sm:$0xff]  }
  0x75   :  { %663 = vmatpush1.bf16.msra.mxu1 %v859_v32 }
  0x77   :  { %308 = vmatmul.mubr.bf16.vlgmr.msra.gmra.mrb[0].mxu0 %v839_v33  ;;  %v860_v33 = vld [vmem:[#allocation8 + $0x64] ss:$8 sps:$4 sm:$0xff]  }
  0x78   :  { %664 = vmatprep.subr.bf16.mxu1 %v860_v33 }
  0x79   :  { %665 = vmatpush1.bf16.msra.mxu1 %v862_v34 }
  0x7a   :  { %666 = vmatprep.subr.bf16.mxu1 %v863_v35 }
  0x7d   :  { %667 = vmatpush1.bf16.msra.mxu1 %v865_v37 }
 0x14a   :  { %v309_v41 = vpop.f32.mrb[0].mxu0 }
 0x14b   :  { %v342_v42 = vadd.f32 %v335_v39, %v309_v41  ;;  %v311_v43 = vpop.f32.mrb[1].mxu0  ;;  %v869_v41 = vld [vmem:[#allocation8 + $0x94] ss:$8 sps:$4 sm:$0xff]  }
 0x14c   :  { %v343_v44 = vadd.f32 %v339_v40, %v311_v43  ;;  %v313_v45 = vpop.f32.mrb[2].mxu0  ;;  %v872_v43 = vld [vmem:[#allocation8 + $0xa4] ss:$8 sps:$4 sm:$0xff]  }
 0x14d   :  { %v350_v46 = vmul.f32 0.70710677, %v342_v42  ;;  %v344_v47 = vadd.f32 %v335_v39, %v313_v45  ;;  %v315_v48 = vpop.f32.mrb[3].mxu0  ;;  %v346_v55 = vmul.f32 0.5, %v342_v42  ;;  %v866_v39 = vld [vmem:[#allocation8 + $0x84] ss:$8 sps:$4 sm:$0xff]  }
 0x14e   :  { %v351_v49 = vmul.f32 0.70710677, %v343_v44  ;;  %v345_v50 = vadd.f32 %v339_v40, %v315_v48  ;;  %v347_v58 = vmul.f32 0.5, %v343_v44  ;;  %v868_v40 = vld [vmem:[#allocation8 + $0x80] ss:$8 sps:$4 sm:$0xff]   ;;  %668 = vmatprep.subr.bf16.mxu1 %v866_v39 }
 0x14f   :  { %890 = verf.f32 %v350_v46  ;;  %v352_v51 = vmul.f32 0.70710677, %v344_v47  ;;  %v348_v63 = vmul.f32 0.5, %v344_v47  ;;  %669 = vmatpush1.bf16.msra.mxu1 %v868_v40  ;;  %v871_v42 = vld [vmem:[#allocation8 + $0x90] ss:$8 sps:$4 sm:$0xff]  }
 0x150   :  { %892 = verf.f32 %v351_v49  ;;  %v353_v52 = vmul.f32 0.70710677, %v345_v50  ;;  %v349_v0 = vmul.f32 0.5, %v345_v50  ;;  %670 = vmatprep.subr.bf16.mxu1 %v869_v41  ;;  %v874_v44 = vld [vmem:[#allocation8 + $0xa0] ss:$8 sps:$4 sm:$0xff]  }
 0x151   :  { %894 = verf.f32 %v352_v51  ;;  %v875_v45 = vld [vmem:[#allocation8 + $0xb4] ss:$8 sps:$4 sm:$0xff]   ;;  %v877_v46 = vld [vmem:[#allocation8 + $0xb0] ss:$8 sps:$4 sm:$0xff]   ;;  %v878_v47 = vld [vmem:[#allocation8 + $0xc4] ss:$8 sps:$4 sm:$0xff]  }
 0x152   :  { %896 = verf.f32 %v353_v52  ;;  %v880_v48 = vld [vmem:[#allocation8 + $0xc0] ss:$8 sps:$4 sm:$0xff]   ;;  %v881_v49 = vld [vmem:[#allocation8 + $0xd4] ss:$8 sps:$4 sm:$0xff]   ;;  %v883_v50 = vld [vmem:[#allocation8 + $0xd0] ss:$8 sps:$4 sm:$0xff]  }
 0x153   :  { %671 = vmatpush1.bf16.msra.mxu1 %v871_v42  ;;  %v884_v51 = vld [vmem:[#allocation8 + $0xe4] ss:$8 sps:$4 sm:$0xff]   ;;  %v886_v52 = vld [vmem:[#allocation8 + $0xe0] ss:$8 sps:$4 sm:$0xff]  }
 0x154   :  { %672 = vmatprep.subr.bf16.mxu1 %v872_v43 }
 0x157   :  { %673 = vmatpush1.bf16.msra.mxu1 %v874_v44 }
 0x158   :  { %674 = vmatprep.subr.bf16.mxu1 %v875_v45 }
 0x159   :  { %v891_v53 = vpop.eup %890 }
 0x15a   :  { %v893_v54 = vpop.eup %892  ;;  %v358_v56 = vadd.f32 1.0, %v891_v53  ;;  %v887_v53 = vld [vmem:[#allocation8 + $0xf4] ss:$8 sps:$4 sm:$0xff]  }
 0x15b   :  { %v895_v57 = vpop.eup %894  ;;  %v359_v59 = vadd.f32 1.0, %v893_v54  ;;  %675 = vmatpush1.bf16.msra.mxu1 %v877_v46  ;;  %v889_v54 = vld [vmem:[#allocation8 + $0xf0] ss:$8 sps:$4 sm:$0xff]  }
 0x15c   :  { %v897_v60 = vpop.eup %896  ;;  %v362_v61 = vmul.f32 %v358_v56, %v346_v55  ;;  %v360_v62 = vadd.f32 1.0, %v895_v57  ;;  %676 = vmatprep.subr.bf16.mxu1 %v878_v47 }
 0x15d   :  { %v363_v1 = vmul.f32 %v359_v59, %v347_v58  ;;  %v361_v2 = vadd.f32 1.0, %v897_v60 }
 0x15e   :  { %v364_v4 = vmul.f32 %v360_v62, %v348_v63 }
 0x15f   :  { %v366_v3 = vadd.f32 %v363_v1, %v362_v61  ;;  %v365_v5 = vmul.f32 %v361_v2, %v349_v0  ;;  %677 = vmatpush1.bf16.msra.mxu1 %v880_v48 }
 0x160   :  { %678 = vmatprep.subr.bf16.mxu1 %v881_v49 }
 0x161   :  { %367 = vadd.xlane.f32.xlu0 %v366_v3  ;;  %v369_v6 = vadd.f32 %v365_v5, %v364_v4 }
 0x163   :  { %679 = vmatpush1.bf16.msra.mxu1 %v883_v50 }
 0x164   :  { %680 = vmatprep.subr.bf16.mxu1 %v884_v51 }
 0x165   :  { %370 = vadd.xlane.f32.xlu0 %v369_v6 }
 0x167   :  { %681 = vmatpush1.bf16.msra.mxu1 %v886_v52 }
 0x168   :  { %682 = vmatprep.subr.bf16.mxu1 %v887_v53 }
 0x16b   :  { %683 = vmatpush1.bf16.msra.mxu1 %v889_v54 }
 0x1ee   :  { %v368_v18 = vpop.xlane.xlu0 %367 }
 0x1ef   :  { %v373_v19 = vmul.f32 0.00390625, %v368_v18 }
 0x1f1   :  { %v1109_v20 = vsub.f32 %v362_v61, %v373_v19  ;;  %v1111_v21 = vsub.f32 %v363_v1, %v373_v19 }
 0x1f2   :  { %v371_v22 = vpop.xlane.xlu0 %370 }
 0x1f3   :  { %v374_v23 = vmul.f32 0.00390625, %v371_v22  ;;  %v379_v24 = vmul.f32 %v1109_v20, %v1109_v20  ;;  %v380_v25 = vmul.f32 %v1111_v21, %v1111_v21 }
 0x1f5   :  { %v1117_v26 = vsub.f32 %v364_v4, %v374_v23  ;;  %v1119_v27 = vsub.f32 %v365_v5, %v374_v23  ;;  %v383_v28 = vadd.f32 %v380_v25, %v379_v24 }
 0x1f7   :  { %384 = vadd.xlane.f32.xlu1 %v383_v28  ;;  %v381_v29 = vmul.f32 %v1117_v26, %v1117_v26  ;;  %v382_v30 = vmul.f32 %v1119_v27, %v1119_v27 }
 0x1f9   :  { %v386_v31 = vadd.f32 %v382_v30, %v381_v29 }
 0x1fb   :  { %387 = vadd.xlane.f32.xlu1 %v386_v31 }
 0x284   :  { %v385_v55 = vpop.xlane.xlu1 %384 }
 0x285   :  { %v390_v56 = vmul.f32 0.003921569, %v385_v55 }
 0x287   :  { %898 = vrsqrt.f32 %v390_v56  ;;  %vm394_vm0 = vcmp.eq.f32.partialorder %v390_v56, inf  ;;  %v397_v61 = vand.u32 2147483648, %v390_v56  ;;  %vm396_vm1 = vcmp.eq.f32.partialorder %v390_v56, 0.0 }
 0x288   :  { %v388_v57 = vpop.xlane.xlu1 %387 }
 0x289   :  { %v391_v58 = vmul.f32 0.003921569, %v388_v57 }
 0x28b   :  { %900 = vrsqrt.f32 %v391_v58  ;;  %vm401_vm2 = vcmp.eq.f32.partialorder %v391_v58, inf  ;;  %v404_v3 = vand.u32 2147483648, %v391_v58  ;;  %vm403_vm3 = vcmp.eq.f32.partialorder %v391_v58, 0.0 }
 0x291   :  { %v899_v59 = vpop.eup %898 }
 0x292   :  { %v393_v60 = vmul.f32 %v899_v59, %v390_v56 }
 0x294   :  { %v395_v62 = vsel %vm394_vm0, %v390_v56, %v393_v60 }
 0x295   :  { %v901_v63 = vpop.eup %900  ;;  %v398_v0 = vsel %vm396_vm1, %v397_v61, %v395_v62 }
 0x296   :  { %v400_v1 = vmul.f32 %v901_v63, %v391_v58  ;;  %v406_v2 = vadd.f32 1e-06, %v398_v0 }
 0x298   :  { %v402_v4 = vsel %vm401_vm2, %v391_v58, %v400_v1  ;;  %902 = vrcp.f32 %v406_v2 }
 0x299   :  { %v405_v5 = vsel %vm403_vm3, %v404_v3, %v402_v4 }
 0x29a   :  { %v407_v6 = vadd.f32 1e-06, %v405_v5 }
 0x29c   :  { %904 = vrcp.f32 %v407_v6 }
 0x2a2   :  { %v903_v8 = vpop.eup %902 }
 0x2a3   :  { %v412_v9 = vmul.f32 %v903_v8, %v1111_v21  ;;  %v411_v13 = vmul.f32 %v903_v8, %v1109_v20  ;;  %v480_v20 = vld [vmem:[%s1162_s6] sm:$0x3]  ;;  %s972_s6 = scalar_lea.vmem %s705_s19, 512 }
 0x2a4   :  { %v489_v32 = vrot.slane %v480_v20, %v1105_v38  ;;  %p973_p10 = scmp.ne.s32.totalorder %s705_s19, %s972_s6  ;;  %p978_p12 = scmp.lt.s32.totalorder %s972_s6, %s972_s6 }
 0x2a5   :  { %v427_v18 = vmul.f32 %v423_v11, %v412_v9  ;;  %v426_v21 = vmul.f32 %v419_v10, %v411_v13 }
 0x2a6   :  { %v905_v14 = vpop.eup %904  ;;  %p979_p13 = por %p978_p12, %p977_p11 }
 0x2a7   :  { %v414_v17 = vmul.f32 %v905_v14, %v1119_v27  ;;  %v413_v19 = vmul.f32 %v905_v14, %v1117_v26  ;;  %v443_v24 = vadd.f32 %v439_v16, %v427_v18  ;;  %v442_v28 = vadd.f32 %v435_v15, %v426_v21 }
 0x2a8   :  { %v485_v27 = vrot.slane %v480_v20, %v1100_v36  ;;  %p980_p0 = pnand %p979_p13, %p973_p10 }
 0x2a9   :  { %v429_v22 = vmul.f32 %v423_v11, %v414_v17  ;;  %v428_v23 = vmul.f32 %v419_v10, %v413_v19 }
 0x2ab   :  { %v445_v25 = vadd.f32 %v439_v16, %v429_v22  ;;  %v444_v29 = vadd.f32 %v435_v15, %v428_v23 }
 0x2ad   :  { %v447_v30 = vpack.c.bf16 %v445_v25, %v443_v24  ;;  %v446_v31 = vpack.c.bf16 %v444_v29, %v442_v28 }
 0x2af   :  { %684 = vmatprep.mubr.bf16.mxu1 %v447_v30 }
 0x2b0   :  { %685 = vmatmul.mubr.bf16.vlgmr.msra.gmra.mrb[0].mxu1 %v446_v31 }
 0x383   :  { %v686_v26 = vpop.f32.mrb[0].mxu1 }
 0x384   :  { %v687_v33 = vadd.f32 %v686_v26, %v485_v27  ;;  %v688_v34 = vpop.f32.mrb[1].mxu1 }
 0x385   :  { %v689_v35 = vadd.f32 %v688_v34, %v489_v32  ;;  %v690_v37 = vpop.f32.mrb[2].mxu1 }
 0x386   :  { %695 = vst [vmem:[#allocation9] sm:$0xff] %v687_v33  ;;  %v691_v39 = vadd.f32 %v690_v37, %v485_v27  ;;  %v692_v40 = vpop.f32.mrb[3].mxu1 }
 0x387   :  { %696 = vst [vmem:[#allocation9 + $0x8] sm:$0xff] %v689_v35  ;;  %v693_v41 = vadd.f32 %v692_v40, %v489_v32 }
 0x388   :  { %697 = vst [vmem:[#allocation9 + $0x10] sm:$0xff] %v691_v39 }
 0x389   :  { %698 = vst [vmem:[#allocation9 + $0x18] sm:$0xff] %v693_v41 }
 0x38a   :  { %983 = shalt.err (!%p980_p0)
}
 0x38b   :  { %s984_s22 = scalar_lea.hbm %s1163_s7, 512 }
 0x38c   :  { %p985_p1 = scmp.ne.s32.totalorder %s1163_s7, %s984_s22  ;;  %p988_p2 = scmp.lt.u32.totalorder %s984_s22, %s1163_s7 }
 0x38e   :  { %p990_p3 = pnand %p988_p2, %p985_p1 }
 0x390   :  { %993 = shalt.err (!%p990_p3)
}
 0x391   :  { %s1006_s26 = smov 256   ;;  %s1007_s28 = smov 16  }
 0x392   :  { %710 = dma.vmem_to_hbm [thread:$0]  %s705_s19, 512, %s1163_s7, [#allocation5], %s1006_s26, %s1006_s26, %s1007_s28  }
 0x393   :  { %998 = dma.done.wait [#allocation5], 512  }
 0x394   :  { %999 = vsyncadd [#allocation5], 4294966784 }
 0x395   :  { %714 = vsyncpa [#allocation4], 1 }
 0x396   :  { %715 = vsyncpa [#allocation7], 1 }
 0x397   :  { %716 = vsyncpa [#allocation5], 1 }

</bundles_post_ra>
